<compile_context>
chip_gen: v7x
topology: tpu7x:2x2x1
jax: 0.10.0
libtpu: 0.0.40
codegen_flags: <defaults>
</compile_context>

<pallas_src>
import numpy as np
import jax
import jax.numpy as jnp
from jax.experimental import pallas as pl
from jax.experimental.pallas import tpu as pltpu


# --------------------------------------------------------------------------
# Pass 1: per-edge relation transform.  Each edge tile holds a single relation
# (host-side grouping), so the block-diagonal transform is one (tile_E, H) @
# (H, H) MXU matmul with that relation's (zero off-block) dense weight.
# --------------------------------------------------------------------------
def _edge_message_kernel(tile_rel_ref,            # scalar prefetch (SMEM), drives w index_map
                         xsrc_ref, w_ref, msg_ref):
    msg_ref[...] = jnp.dot(xsrc_ref[...], w_ref[0],
                           preferred_element_type=jnp.float32).astype(msg_ref.dtype)


# --------------------------------------------------------------------------
# Pass 2: edge -> node scatter-add as an in-kernel one-hot MXU contraction,
# walking only the edge tiles that touch this node tile (sparsity schedule).
# Accumulator is seeded with the precomputed self-loop (+bias) term.
# --------------------------------------------------------------------------
def _scatter_kernel(sched_ref, valid_ref,         # scalar prefetch (SMEM)
                    msg_ref, dst_ref, sl_ref, out_ref, acc_ref):
    ni = pl.program_id(0)
    t = pl.program_id(1)
    n_slots = pl.num_programs(1)
    tile_n = acc_ref.shape[0]
    tile_e = msg_ref.shape[0]

    @pl.when(t == 0)
    def _():
        acc_ref[...] = sl_ref[...].astype(jnp.float32)

    @pl.when(valid_ref[ni * n_slots + t] != 0)
    def _():
        # one-hot: iota along sublanes (nodes), dst along lanes (edges)
        node_ids = ni * tile_n + jax.lax.broadcasted_iota(
            jnp.int32, (tile_n, tile_e), 0)                      # (tile_N, tile_E)
        onehot = (dst_ref[0] == node_ids).astype(jnp.float32)    # (tile_N, tile_E)
        acc_ref[...] += jnp.dot(onehot, msg_ref[...],
                                preferred_element_type=jnp.float32)

    @pl.when(t == n_slots - 1)
    def _():
        out_ref[...] = acc_ref[...].astype(out_ref.dtype)


def rgcn_bdd_layer(x, src, dst, rel, norm, w_bdd, loop_w, bias,
                   *, tile_e=128, tile_n=128):
    # MXU-native defaults; on v6e/v7x at real scale use 256 for both.
    N, H = x.shape
    R2, B, s_in, s_out = w_bdd.shape

    # ---- lane-dense feature padding (exact: padded cols are zero, sliced off)
    h_pad = ((H + 127) // 128) * 128
    x_p = jnp.pad(x, ((0, 0), (0, h_pad - H)))
    loop_w_p = jnp.pad(loop_w, ((0, h_pad - H), (0, h_pad - H)))
    bias_p = jnp.pad(bias, (0, h_pad - H)).astype(x.dtype)

    # ---- node padding: multiple of tile_n, >= 2 node tiles (v7x 2-TC sharding)
    n_n_tiles = max(2, -(-N // tile_n))
    n_pad = n_n_tiles * tile_n

    # ---- self-loop + bias outside the kernel (plain XLA matmul), pre-padded
    sl = (x_p @ loop_w_p + bias_p[None, :]).astype(x.dtype)       # (N, h_pad)
    sl = jnp.pad(sl, ((0, n_pad - N), (0, 0)))                    # (n_pad, h_pad)

    # ---- dense (zero off-block) embedding of bdd weights -> (R2, h_pad, h_pad)
    eye_b = jnp.eye(B, dtype=x.dtype)
    w_full = jnp.einsum('bc,rbio->rbico', eye_b, w_bdd.astype(x.dtype))
    w_full = w_full.reshape(R2, B * s_in, B * s_out)
    w_full = jnp.pad(w_full, ((0, 0), (0, h_pad - B * s_in), (0, h_pad - B * s_out)))

    # ---- host-side glue (concrete graph prep, like DGL): group edges by
    # relation, pad each group to a multiple of tile_e so every edge tile maps
    # to exactly one relation weight block (scalar-prefetched index_map).
    rel_np = np.asarray(rel)
    src_np = np.asarray(src)
    dst_np = np.asarray(dst)
    norm_np = np.asarray(norm)

    src_g, dst_g, norm_g, valid_g, tile_rel = [], [], [], [], []
    for r in range(R2):
        idx = np.nonzero(rel_np == r)[0]
        if idx.size == 0:
            continue
        nt = -(-idx.size // tile_e)
        pad = nt * tile_e - idx.size
        src_g.append(np.concatenate([src_np[idx], np.zeros(pad, np.int64)]))
        dst_g.append(np.concatenate([dst_np[idx], np.zeros(pad, np.int64)]))
        norm_g.append(np.concatenate([norm_np[idx], np.zeros(pad, np.float32)]))
        valid_g.append(np.concatenate([np.ones(idx.size, bool), np.zeros(pad, bool)]))
        tile_rel += [r] * nt
    if not tile_rel:                        # graph with no edges: one dummy tile
        src_g = [np.zeros(tile_e, np.int64)]
        dst_g = [np.zeros(tile_e, np.int64)]
        norm_g = [np.zeros(tile_e, np.float32)]
        valid_g = [np.zeros(tile_e, bool)]
        tile_rel = [0]

    src_p = np.concatenate(src_g).astype(np.int32)
    dst_p = np.concatenate(dst_g).astype(np.int32)
    norm_p = np.concatenate(norm_g).astype(np.float32)
    valid_p = np.concatenate(valid_g)
    tile_rel = np.asarray(tile_rel, np.int32)
    e_pad = int(src_p.shape[0])
    n_e_tiles = e_pad // tile_e

    # ---- sparsity schedule for pass 2: per node tile, which edge tiles hit it
    dst_tiles = dst_p.reshape(n_e_tiles, tile_e)
    val_tiles = valid_p.reshape(n_e_tiles, tile_e)
    per_node = []
    for ni in range(n_n_tiles):
        lo, hi = ni * tile_n, (ni + 1) * tile_n
        hits = [et for et in range(n_e_tiles)
                if np.any((dst_tiles[et] >= lo) & (dst_tiles[et] < hi) & val_tiles[et])]
        per_node.append(hits)
    n_slots = max(1, max(len(h) for h in per_node))
    sched = np.zeros((n_n_tiles, n_slots), np.int32)
    valid = np.zeros((n_n_tiles, n_slots), np.int32)
    for ni, hits in enumerate(per_node):
        for t, et in enumerate(hits):
            sched[ni, t] = et
            valid[ni, t] = 1
    sched_flat = jnp.asarray(sched.reshape(-1))      # 1-D (SMEM 2-D padding is wasteful)
    valid_flat = jnp.asarray(valid.reshape(-1))
    n_valid_pairs = int(valid.sum())

    # ---- glue gather: source features with edge norm folded in (padded edges
    # have norm == 0, so their messages are exactly zero).
    x_src = x_p[jnp.asarray(src_p)] * jnp.asarray(norm_p)[:, None]    # (E_pad, h_pad)
    dst3 = jnp.asarray(dst_p).reshape(n_e_tiles, 1, tile_e)           # lane-dense dst
    tile_rel_j = jnp.asarray(tile_rel)

    # ------------------- pass 1: messages over edge tiles only ---------------
    msg = pl.pallas_call(
        _edge_message_kernel,
        out_shape=jax.ShapeDtypeStruct((e_pad, h_pad), x.dtype),
        grid_spec=pltpu.PrefetchScalarGridSpec(
            num_scalar_prefetch=1,
            grid=(n_e_tiles,),
            in_specs=[
                pl.BlockSpec((tile_e, h_pad), lambda e, tr: (e, 0)),
                pl.BlockSpec((1, h_pad, h_pad), lambda e, tr: (tr[e], 0, 0)),
            ],
            out_specs=pl.BlockSpec((tile_e, h_pad), lambda e, tr: (e, 0)),
        ),
        compiler_params=pltpu.CompilerParams(
            dimension_semantics=("parallel",),
            vmem_limit_bytes=48 * 1024 * 1024),
        cost_estimate=pl.CostEstimate(
            flops=int(2 * e_pad * h_pad * h_pad),
            transcendentals=0,
            bytes_accessed=int(4 * (2 * e_pad * h_pad + n_e_tiles * h_pad * h_pad))),
    )(tile_rel_j, x_src, w_full)

    # ------------------- pass 2: sparse node-tile scatter-add ----------------
    def msg_map(ni, t, sched_ref, valid_ref, _L=n_slots):
        return (sched_ref[ni * _L + t], 0)

    def dst_map(ni, t, sched_ref, valid_ref, _L=n_slots):
        return (sched_ref[ni * _L + t], 0, 0)

    out_full = pl.pallas_call(
        _scatter_kernel,
        out_shape=jax.ShapeDtypeStruct((n_pad, h_pad), x.dtype),
        grid_spec=pltpu.PrefetchScalarGridSpec(
            num_scalar_prefetch=2,
            grid=(n_n_tiles, n_slots),
            in_specs=[
                pl.BlockSpec((tile_e, h_pad), msg_map),
                pl.BlockSpec((1, 1, tile_e), dst_map),
                pl.BlockSpec((tile_n, h_pad), lambda ni, t, s, v: (ni, 0)),
            ],
            out_specs=pl.BlockSpec((tile_n, h_pad), lambda ni, t, s, v: (ni, 0)),
            scratch_shapes=[pltpu.VMEM((tile_n, h_pad), jnp.float32)],
        ),
        compiler_params=pltpu.CompilerParams(
            dimension_semantics=("parallel", "arbitrary"),
            vmem_limit_bytes=48 * 1024 * 1024),
        cost_estimate=pl.CostEstimate(
            flops=int(2 * n_valid_pairs * tile_n * tile_e * h_pad + 2 * n_pad * h_pad),
            transcendentals=0,
            bytes_accessed=int(4 * (n_valid_pairs * (tile_e * h_pad + tile_e)
                                    + 2 * n_pad * h_pad))),
    )(sched_flat, valid_flat, msg, dst3, sl)

    return out_full[:N, :H]


def link_predict_forward(params, node_ids, src, dst, rel, norm):
    # EmbeddingLayer (glue gather on squeezed node ids)
    x = params["embedding"][jnp.squeeze(node_ids)]
    # single RelGraphConv('bdd') hidden layer, activation=None, dropout=0
    return rgcn_bdd_layer(x, src, dst, rel, norm,
                          params["w_bdd"], params["loop_w"], params["bias"])


def link_predict_forward_ref(params, node_ids, src, dst, rel, norm):
    # pure-JAX reference mirroring DGL's bdd_message_func + sum + self-loop
    x = params["embedding"][jnp.squeeze(node_ids)]
    N, H = x.shape
    R2, B, s, _ = params["w_bdd"].shape
    E = src.shape[0]
    xb = x[src].reshape(E, B, 1, s)                     # (E, B, 1, s)
    wb = params["w_bdd"][rel]                           # (E, B, s, s)
    msg = jnp.matmul(xb, wb).reshape(E, H)              # (E, H)
    msg = msg * norm.reshape(E, 1)
    agg = jnp.zeros((N, H), x.dtype).at[dst].add(msg)
    return agg + x @ params["loop_w"] + params["bias"][None, :]


if __name__ == "__main__":
    N, H, num_rels, B = 16, 32, 4, 4     # nodes, h_dim, num_rels, num_bases
    R2 = 2 * num_rels
    s = H // B
    E = 24                               # edges

    key = jax.random.PRNGKey(0)
    k = jax.random.split(key, 8)
    gain = jnp.sqrt(2.0)                 # calculate_gain('relu')

    def xavier(kk, shape, fan_in, fan_out):
        limit = gain * jnp.sqrt(6.0 / (fan_in + fan_out))
        return jax.random.uniform(kk, shape, jnp.float32, -limit, limit)

    params = {
        "embedding": jax.random.normal(k[0], (N, H), jnp.float32),   # nn.Embedding
        "w_bdd": xavier(k[1], (R2, B, s, s), s, s),                  # bdd weights
        "loop_w": xavier(k[2], (H, H), H, H),                        # self-loop W
        "bias": jnp.zeros((H,), jnp.float32),                        # RelGraphConv bias
        "w_relation": xavier(k[3], (R2, H), R2, H),                  # unused in forward
    }

    node_ids = jnp.arange(N, dtype=jnp.int32)                        # h
    src = jax.random.randint(k[4], (E,), 0, N, dtype=jnp.int32)      # graph edges
    dst = jax.random.randint(k[5], (E,), 0, N, dtype=jnp.int32)
    rel = jax.random.randint(k[6], (E,), 0, R2, dtype=jnp.int32)     # r
    norm = jax.random.uniform(k[7], (E,), jnp.float32, 0.1, 1.0)     # edge norm

    out = jax.block_until_ready(
        link_predict_forward(params, node_ids, src, dst, rel, norm))
    ref = link_predict_forward_ref(params, node_ids, src, dst, rel, norm)
    assert out.shape == (N, H)
    assert jnp.allclose(out, ref, atol=1e-4, rtol=1e-4), \
        float(jnp.max(jnp.abs(out - ref)))
    print("KERNEL_OK")
</pallas_src>

<mosaic_0001>
module attributes {stable_mosaic.version = 11 : i64} {
  func.func @_edge_message_kernel(%arg0: i32, %arg1: memref<7xi32, #tpu.memory_space<smem>>, %arg2: memref<128x128xf32, #tpu.memory_space<vmem>>, %arg3: memref<1x128x128xf32, #tpu.memory_space<vmem>>, %arg4: memref<128x128xf32, #tpu.memory_space<vmem>>) attributes {dimension_semantics = [#tpu.dimension_semantics<parallel>], iteration_bounds = array<i64: 7>, scalar_prefetch = 1 : i64, scratch_operands = 0 : i64, tpu.core_type = #tpu.core_type<tc>, window_params = [{transform_indices = @transform_0, window_bounds = array<i64: 128, 128>}, {transform_indices = @transform_1, window_bounds = array<i64: 1, 128, 128>}, {transform_indices = @transform_2, window_bounds = array<i64: 128, 128>}]} {
    %c0 = arith.constant 0 : index
    %c0_0 = arith.constant 0 : index
    %0 = vector.load %arg2[%c0, %c0_0] : memref<128x128xf32, #tpu.memory_space<vmem>>, vector<128x128xf32>
    %c0_1 = arith.constant 0 : index
    %c0_2 = arith.constant 0 : index
    %c0_3 = arith.constant 0 : index
    %1 = vector.load %arg3[%c0_1, %c0_2, %c0_3] : memref<1x128x128xf32, #tpu.memory_space<vmem>>, vector<1x128x128xf32>
    %2 = vector.shape_cast %1 : vector<1x128x128xf32> to vector<128x128xf32>
    %cst = arith.constant dense<0.000000e+00> : vector<128x128xf32>
    %3 = tpu.matmul %0, %2, %cst {dimension_numbers = #tpu.dot_dimension_numbers<[1], [0], [0], [1], [0, 0, 1, 1], [], []>} : vector<128x128xf32>, vector<128x128xf32>, vector<128x128xf32> -> vector<128x128xf32>
    %c0_4 = arith.constant 0 : index
    %c0_5 = arith.constant 0 : index
    %4 = vector.load %arg4[%c0_4, %c0_5] : memref<128x128xf32, #tpu.memory_space<vmem>>, vector<128x128xf32>
    tpu.vector_store %arg4[%c0_4, %c0_5], %3 {strides = array<i32>} : memref<128x128xf32, #tpu.memory_space<vmem>>, vector<128x128xf32>,
    return
  }
  func.func @transform_0(%arg0: i32, %arg1: memref<7xi32, #tpu.memory_space<smem>>) -> (i32, i32) {
    %c0_i32 = arith.constant 0 : i32
    %c0_i32_0 = arith.constant 0 : i32
    return %arg0, %c0_i32 : i32, i32
  }
  func.func @transform_1(%arg0: i32, %arg1: memref<7xi32, #tpu.memory_space<smem>>) -> (i32, i32, i32) {
    %0 = arith.index_cast %arg0 : i32 to index
    %1 = memref.load %arg1[%0] : memref<7xi32, #tpu.memory_space<smem>>
    %c0_i32 = arith.constant 0 : i32
    %c0_i32_0 = arith.constant 0 : i32
    %c0_i32_1 = arith.constant 0 : i32
    return %1, %c0_i32, %c0_i32_0 : i32, i32, i32
  }
  func.func @transform_2(%arg0: i32, %arg1: memref<7xi32, #tpu.memory_space<smem>>) -> (i32, i32) {
    %c0_i32 = arith.constant 0 : i32
    %c0_i32_0 = arith.constant 0 : i32
    return %arg0, %c0_i32 : i32, i32
  }
}

</mosaic_0001>

<bundles_post_ra>
// kernel: tpu_custom_call.1
= control target key start
LH: loop header
LB: loop body
LE: loop exit
PB: predicated region body
PF: predicated region fallthrough
CT: control target
= control target key end

     0   :  { %s1301_s0 = inlined_call_operand.hbm [shape: s32[7], index: 0, kind: input, shape index: {}]   ;;  %s1302_s1 = inlined_call_operand.hbm [shape: f32[896,128], index: 1, kind: input, shape index: {}]   ;;  %s1303_s2 = inlined_call_operand.hbm [shape: f32[8,128,128], index: 2, kind: input, shape index: {}]   ;;  %s1304_s3 = inlined_call_operand.hbm [shape: f32[896,128], index: 3, kind: output, shape index: {}]  }
   0x1   :  { %1313 = sst [smem:[#allocation16_spill]] %s1302_s1  ;;  %s757_s14 = scalar_lea.hbm %s1301_s0, 16 }
   0x2   :  { %p758_p0 = scmp.ne.s32.totalorder %s1301_s0, %s757_s14  ;;  %p761_p1 = scmp.lt.u32.totalorder %s757_s14, %s1301_s0 }
   0x4   :  { %p763_p2 = pnand %p761_p1, %p758_p0 }
   0x6   :  { %766 = shalt.err (!%p763_p2)  }
   0x7   :  { %s925_s19 = smov [#allocation3]  }
   0x8   :  { %9 = dma.hbm_to_smem %s1301_s0, 16, %s925_s19, [#allocation2] }
   0x9   :  { %883 = dma.done.wait [#allocation2], 16 }
   0xa   :  { %884 = vsyncadd [#allocation2], 4294967280 }
   0xb   :  { %11 = sfence }
   0xc   :  { %12 = vsyncpa [#allocation5], 0 }
   0xd   :  { %14 = vsyncpa [#allocation5 + $0x1], 0 }
   0xe   :  { %15 = vsyncpa [#allocation8], 0 }
   0xf   :  { %17 = vsyncpa [#allocation8 + $0x1], 0 }
  0x10   :  { %18 = vsyncpa [#allocation6], 0 }
  0x11   :  { %20 = vsyncpa [#allocation6 + $0x1], 0  ;;  %s965_s22 = smov 0   ;;  %s967_s23 = smov 0  }
  0x12   :  { %s969_s24 = smov 0   ;;  %s971_s25 = smov 0  }
  0x13   :  { %s973_s26 = smov 0   ;;  %s975_s0 = smov 0  }
  0x14   :  { %s977_s27 = smov 0  }
  0x15 LB: > { %s1001_s28 = sadd.s32 4294967295, %s923_s27   ;;  %s516_s29 = sadd.s32 4294967294, %s923_s27   ;;  %s923_s27 = sphi %s977_s27, %s1341_s27   ;;  %s919_s0 = sphi %s975_s0, %s1340_s0   ;;  %s915_s26 = sphi %s973_s26, %s1339_s26   ;;  %s911_s25 = sphi %s971_s25, %s1338_s25   ;;  %s907_s24 = sphi %s969_s24, %s1337_s24   ;;  %s903_s23 = sphi %s967_s23, %s1336_s23   ;;  %s899_s22 = sphi %s965_s22, %s1335_s22  }
  0x16   : > { %s1005_s30 = sadd.s32 1, %s923_s27   ;;  %s33_s4 = sadd.s32 1, %s919_s0 }
  0x17   : > { %s30_s5 = ssub.s32 %s923_s27, %s1005_s30  ;;  %p40_p3 = scmp.ne.s32.totalorder %s919_s0, %s915_s26 }
  0x18   : > { %p31_p4 = scmp.eq.s32.totalorder %s30_s5, 0  ;;  %p1306_p5 = scmp.eq.s32.totalorder %s923_s27, 0 }
  0x19   : > { %p46_p6 = scmp.ne.s32.totalorder %s915_s26, %s911_s25  ;;  %p1307_p7 = scmp.eq.s32.totalorder %s1001_s28, 0 }
  0x1a   : > { %s1017_s6 = scalar_select %p31_p4, %s919_s0, %s33_s4  }
  0x1b   : > { %p1021_p8 = por %p1306_p5, %p40_p3  ;;  %p1027_p9 = por %p1307_p7, %p46_p6 }
  0x1c   : > { %s1032_s9 = sld [smem:[#allocation3 + %s1005_s30]]  ;;  %p98_p10 = scmp.eq.s32.totalorder %s1001_s28, 6 }
  0x1d   : > { %s1315_s8 = scalar_select %p1027_p9, 1, 0 }
  0x1e   : > { %p104_p11 = scmp.eq.s32.totalorder %s516_s29, 6  ;;  %p1035_p12 = por %p98_p10, %p40_p3 }
  0x1f   : > { %p1305_p13 = scmp.lt.s32.totalorder %s923_s27, 7  ;;  %s124_s12 = sand.u32 1, %s919_s0  }
  0x20   : > { %s1316_s10 = scalar_select %p1035_p12, 1, 0 }
  0x21   : > { %p1040_p0 = por %p104_p11, %p46_p6  ;;  %s519_s13 = sshll.u32 %s124_s12, 7 }
  0x22   : > { %s534_s14 = sshll.u32 %s923_s27, 11  ;;  %s1318_s1 = sld [smem:[#allocation16_spill]] }
  0x23   : > { %s1317_s11 = scalar_select %p1040_p0, 1, 0 }
  0x24   : > { %s128_s18 = scalar_lea.vmem [#allocation4], %s519_s13  ;;  %p1057_p1 = pnand %p1305_p13, %p1021_p8 }
  0x25   : > { %s135_s19 = sshll.u32 %s128_s18, 4  ;;  %s1062_s21 = scalar_lea.sflag [#allocation5], %s124_s12  ;;  %s1051_s19 = int_to_ptr.vmem [resolvable:$true] %s135_s19 }
  0x26   : > { %p769_p4 = pneg %p1057_p1 }
  0x28   : > { %s1049_s17 = scalar_lea.hbm %s1318_s1, %s534_s14  ;;  %s772_s7 = scalar_lea.hbm %s1318_s1, 14336 }
  0x29   : > { %s767_s29 = scalar_lea.hbm %s1049_s17, 2048  ;;  %p773_p8 = scmp.lt.u32.totalorder %s1049_s17, %s1318_s1 }
  0x2a   : > { %p768_p3 = scmp.ne.s32.totalorder %s1049_s17, %s767_s29  ;;  %p774_p11 = scmp.lt.u32.totalorder %s772_s7, %s767_s29 }
  0x2b   : > { %p776_p5 = scmp.lt.u32.totalorder %s767_s29, %s1049_s17 }
  0x2c   : > { %p770_p6 = pnand %p769_p4, %p768_p3  ;;  %p775_p13 = por %p774_p11, %p773_p8 }
  0x2e   : > { %p771_p10 = pneg %p770_p6  ;;  %p777_p7 = por %p776_p5, %p775_p13 }
  0x30   : > { %p778_p2 = pnand %p777_p7, %p771_p10 }
  0x32   : > { %781 = shalt.err (!%p778_p2)
}
  0x33   : > { %s782_s12 = scalar_lea.vmem %s1051_s19, 2048  ;;  %s926_s15 = smov [#allocation4]  }
  0x34   : > { %p783_p3 = scmp.ne.s32.totalorder %s1051_s19, %s782_s12  ;;  %s787_s16 = sshll.u32 %s926_s15, 4  ;;  %s788_s16 = int_to_ptr.vmem [resolvable:$false] %s787_s16 }
  0x35   : > { %s789_s18 = scalar_lea.vmem %s788_s16, 4096  ;;  %p790_p12 = scmp.lt.s32.totalorder %s1051_s19, %s788_s16 }
  0x36   : > { %p785_p6 = pnand %p783_p3, %p769_p4  ;;  %p791_p8 = scmp.lt.s32.totalorder %s789_s18, %s782_s12 }
  0x38   : > { %p786_p0 = pneg %p785_p6  ;;  %p792_p11 = por %p791_p8, %p790_p12 }
  0x3a   : > { %p793_p5 = pnand %p792_p11, %p786_p0 }
  0x3c   : > { %796 = shalt.err (!%p793_p5)
}
  0x3d   : > { %s1309_s29 = smov 128   ;;  %s1310_s4 = smov 8  }
  0x3e   : > { %684 = dma.hbm_to_vmem [thread:$0]  (!%p1057_p1), %s1049_s17, 2048, %s1051_s19, %s1062_s21, %s1309_s29, %s1309_s29, %s1310_s4  }
  0x3f   : > { %p165_p7 = scmp.lt.s32.totalorder %s923_s27, 8  ;;  %p1320_p12 = scmp.ge.s32.totalorder %s923_s27, 1 }
  0x40   : > { %s56_s7 = sld [smem:[#allocation3 + %s923_s27]]  ;;  %p68_p0 = scmp.ne.s32.totalorder %s907_s24, %s903_s23 }
  0x41   : > { %p1096_p13 = pnand %p1320_p12, %p165_p7  ;;  %p74_p2 = scmp.ne.s32.totalorder %s903_s23, %s899_s22 }
  0x42   : > { %p1322_p4 = scmp.eq.s32.totalorder %s1001_s28, 0  ;;  %s145_s13 = sand.u32 1, %s907_s24  }
  0x43   : > { %p1324_p3 = scmp.eq.s32.totalorder %s923_s27, 0  ;;  %s61_s17 = sadd.s32 1, %s907_s24 }
  0x44   : > { %p1107_p10 = por %p74_p2, %p1322_p4  ;;  %s522_s21 = sshll.u32 %s145_s13, 7 }
  0x45   : > { %p70_p1 = por %p68_p0, %p1324_p3  ;;  %p1325_p8 = scmp.lt.s32.totalorder %s923_s27, 7 }
  0x46   : > { %s1323_s20 = scalar_select %p1107_p10, 1, 0 }
  0x47   : > { %s58_s19 = ssub.s32 %s56_s7, %s1032_s9  ;;  %p1118_p11 = pnand %p1325_p8, %p70_p1 }
  0x48   : > { %p59_p6 = scmp.eq.s32.totalorder %s58_s19, 0  ;;  %p1327_p5 = pmov %p1325_p8 }
  0x49   : > { %s674_s22 = scalar_select %p70_p1, [#allocation3], [#allocation10] }
  0x4a   : > { %s1123_s12 = scalar_select %p59_p6, %s907_s24, %s61_s17  }
  0x4b   : > { %s675_s15 = scalar_select %p70_p1, %s923_s27, 0 }
  0x4c   : > { %s1343_s22 = smov (!%p1327_p5, %s674_s22), [#allocation11]  ;;  %p1328_p7 = pmov %p1327_p5 }
  0x4d   : > { %s149_s18 = scalar_lea.vmem [#allocation7], %s522_s21  ;;  %s1137_s17 = scalar_lea.sflag [#allocation8], %s145_s13 }
  0x4e   : > { %s1345_s15 = smov (!%p1328_p7, %s675_s15), 0  ;;  %s157_s9 = sshll.u32 %s149_s18, 4  ;;  %s1130_s9 = int_to_ptr.vmem [resolvable:$true] %s157_s9 }
  0x4f   : > { %s150_s16 = sld [smem:[%s1343_s22 + %s1345_s15]]  ;;  %p799_p0 = pneg %p1118_p11 }
  0x50   : > { %s802_s29 = scalar_lea.hbm %s1303_s2, 16384 }
  0x55   : > { %s535_s7 = sshll.u32 %s150_s16, 11 }
  0x56   : > { %s1135_s4 = scalar_lea.hbm %s1303_s2, %s535_s7 }
  0x57   : > { %s797_s1 = scalar_lea.hbm %s1135_s4, 2048  ;;  %p803_p3 = scmp.lt.u32.totalorder %s1135_s4, %s1303_s2 }
  0x58   : > { %p798_p12 = scmp.ne.s32.totalorder %s1135_s4, %s797_s1  ;;  %p804_p1 = scmp.lt.u32.totalorder %s802_s29, %s797_s1 }
  0x59   : > { %p806_p8 = scmp.lt.u32.totalorder %s797_s1, %s1135_s4 }
  0x5a   : > { %p800_p2 = pnand %p799_p0, %p798_p12  ;;  %p805_p6 = por %p804_p1, %p803_p3 }
  0x5c   : > { %p801_p4 = pneg %p800_p2  ;;  %p807_p5 = por %p806_p8, %p805_p6 }
  0x5e   : > { %p808_p7 = pnand %p807_p5, %p801_p4 }
  0x60   : > { %811 = shalt.err (!%p808_p7)
}
  0x61   : > { %s812_s13 = scalar_lea.vmem %s1130_s9, 2048  ;;  %s929_s18 = smov [#allocation7]  }
  0x62   : > { %p813_p12 = scmp.ne.s32.totalorder %s1130_s9, %s812_s13  ;;  %s817_s7 = sshll.u32 %s929_s18, 4  ;;  %s818_s7 = int_to_ptr.vmem [resolvable:$false] %s817_s7 }
  0x63   : > { %s819_s19 = scalar_lea.vmem %s818_s7, 4096  ;;  %p820_p9 = scmp.lt.s32.totalorder %s1130_s9, %s818_s7 }
  0x64   : > { %p815_p2 = pnand %p813_p12, %p799_p0  ;;  %p821_p3 = scmp.lt.s32.totalorder %s819_s19, %s812_s13 }
  0x66   : > { %p816_p10 = pneg %p815_p2  ;;  %p822_p1 = por %p821_p3, %p820_p9 }
  0x68   : > { %p823_p6 = pnand %p822_p1, %p816_p10 }
  0x6a   : > { %826 = shalt.err (!%p823_p6)
}
  0x6b   : > { %s1329_s1 = smov 8   ;;  %s1330_s21 = smov 128  }
  0x6c   : > { %689 = dma.hbm_to_vmem [thread:$0]  (!%p1118_p11), %s1135_s4, 2048, %s1130_s9, %s1137_s17, %s1330_s21, %s1330_s21, %s1329_s1  }
  0x6d   : > { %169 = sbr.rel (%p1096_p13) target bundleno = 396 (0x18c), region = 28  ;;  %s1171_s22 = sand.u32 (!%p1096_p13), 1, %s915_s26  }
  0x6e   : > { %s526_s29 = sshll.u32 (!%p1096_p13), %s1171_s22, 7  ;;  %s172_s15 = scalar_lea.sflag (!%p1096_p13), [#allocation5], %s1171_s22 }
  0x6f   : > { %s1177_s14 = scalar_lea.vmem (!%p1096_p13), [#allocation4], %s526_s29  ;;  %p1331_p9 = scmp.ne.s32.totalorder (!%p1096_p13), %s1315_s8, 0 }
  0x74   : > { %886 = dma.done.wait (%p1331_p9), %s172_s15, 2048  }
  0x75   : > { %888 = vsyncadd (%p1331_p9), %s172_s15, 4294965248  ;;  %s180_s4 = sand.u32 1, %s903_s23   ;;  %p1332_p13 = scmp.ne.s32.totalorder %s1323_s20, 0 }
  0x76   : > { %s527_s5 = sshll.u32 %s180_s4, 7  ;;  %s181_s9 = scalar_lea.sflag [#allocation8], %s180_s4 }
  0x77   : > { %s1184_s17 = scalar_lea.vmem [#allocation7], %s527_s5 }
  0x78   : > { %890 = dma.done.wait (%p1332_p13), %s181_s9, 2048  }
  0x79   : > { %892 = vsyncadd (%p1332_p13), %s181_s9, 4294965248  ;;  %v229_v0 = vld [vmem:[%s1184_s17] sm:$0xff]  ;;  %v230_v1 = vld [vmem:[%s1184_s17 + $0x8] sm:$0xff]  ;;  %s1224_s8 = scalar_lea.vmem [#allocation9], %s526_s29  ;;  %s536_s20 = sshll.u32 %s1001_s28, 11 }
  0x7a   : > { %v231_v2 = vld [vmem:[%s1184_s17 + $0x10] sm:$0xff]  ;;  %v625_v3 = vpack.c.bf16 %v230_v1, %v229_v0  ;;  %v232_v4 = vld [vmem:[%s1184_s17 + $0x18] sm:$0xff]  ;;  %v233_v6 = vld [vmem:[%s1184_s17 + $0x20] sm:$0xff]  ;;  %s420_s16 = sshll.u32 %s1224_s8, 4  ;;  %s1243_s7 = scalar_lea.hbm %s1304_s3, %s536_s20  ;;  %s1245_s16 = int_to_ptr.vmem [resolvable:$true] %s420_s16 }
  0x7b   : > { %v629_v5 = vpack.c.bf16 %v232_v4, %v231_v2  ;;  %v234_v7 = vld [vmem:[%s1184_s17 + $0x28] sm:$0xff]  ;;  %v213_v9 = vld [vmem:[%s1177_s14] sm:$0xff]  ;;  %v235_v11 = vld [vmem:[%s1184_s17 + $0x30] sm:$0xff]  ;;  %s407_s28 = scalar_lea.sflag [#allocation6], %s1171_s22  ;;  %s827_s19 = scalar_lea.vmem %s1245_s16, 2048 }
  0x7c   : > { %626 = vmatprep.subr.bf16.mxu0 %v625_v3  ;;  %657 = vmatprep.subr.bf16.mxu1 %v625_v3  ;;  %v633_v8 = vpack.c.bf16 %v234_v7, %v233_v6  ;;  %v221_v10 = vld [vmem:[%s1177_s14 + $0x40] sm:$0xff]  ;;  %v236_v12 = vld [vmem:[%s1184_s17 + $0x38] sm:$0xff]  ;;  %v238_v15 = vld [vmem:[%s1184_s17 + $0x48] sm:$0xff]  ;;  %p828_p10 = scmp.ne.s32.totalorder %s1245_s16, %s827_s19  ;;  %p1333_p11 = scmp.ne.s32.totalorder %s1316_s10, 0 }
  0x7d   : > { %628 = vmatpush3.bf16.msra.mxu0 %v625_v3  ;;  %665 = vmatpush3.bf16.msra.mxu1 %v625_v3  ;;  %v637_v13 = vpack.c.bf16 %v236_v12, %v235_v11  ;;  %v237_v14 = vld [vmem:[%s1184_s17 + $0x40] sm:$0xff]  ;;  %v239_v17 = vld [vmem:[%s1184_s17 + $0x50] sm:$0xff]  ;;  %v240_v18 = vld [vmem:[%s1184_s17 + $0x58] sm:$0xff]  ;;  %s930_s1 = smov [#allocation9]  }
  0x7e   : > { %630 = vmatprep.subr.bf16.mxu0 %v629_v5  ;;  %658 = vmatprep.subr.bf16.mxu1 %v629_v5  ;;  %v641_v16 = vpack.c.bf16 %v238_v15, %v237_v14  ;;  %v645_v19 = vpack.c.bf16 %v240_v18, %v239_v17  ;;  %v241_v20 = vld [vmem:[%s1184_s17 + $0x60] sm:$0xff]  ;;  %v242_v21 = vld [vmem:[%s1184_s17 + $0x68] sm:$0xff]  ;;  %v243_v23 = vld [vmem:[%s1184_s17 + $0x70] sm:$0xff]  ;;  %p829_p0 = pnand %p828_p10, %p1333_p11  ;;  %s831_s21 = sshll.u32 %s930_s1, 4  ;;  %s832_s21 = int_to_ptr.vmem [resolvable:$false] %s831_s21 }
  0x7f   : > { %601 = vmatprep.mubr.f32.mxu0 %v213_v9  ;;  %613 = vmatprep.mubr.f32.mxu1 %v221_v10  ;;  %v649_v22 = vpack.c.bf16 %v242_v21, %v241_v20  ;;  %v244_v24 = vld [vmem:[%s1184_s17 + $0x78] sm:$0xff]  ;;  %v214_v26 = vld [vmem:[%s1177_s14 + $0x8] sm:$0xff]  ;;  %v215_v28 = vld [vmem:[%s1177_s14 + $0x10] sm:$0xff]  ;;  %s833_s29 = scalar_lea.vmem %s832_s21, 4096  ;;  %p834_p8 = scmp.lt.s32.totalorder %s1245_s16, %s832_s21 }
  0x80   : > { %v653_v25 = vpack.c.bf16 %v244_v24, %v243_v23  ;;  %v222_v27 = vld [vmem:[%s1177_s14 + $0x48] sm:$0xff]  ;;  %v223_v29 = vld [vmem:[%s1177_s14 + $0x50] sm:$0xff]  ;;  %v216_v30 = vld [vmem:[%s1177_s14 + $0x18] sm:$0xff]  ;;  %p830_p4 = pneg %p829_p0  ;;  %p835_p5 = scmp.lt.s32.totalorder %s833_s29, %s827_s19 }
  0x81   : > { %632 = vmatpush3.bf16.msra.mxu0 %v629_v5  ;;  %666 = vmatpush3.bf16.msra.mxu1 %v629_v5  ;;  %v224_v31 = vld [vmem:[%s1177_s14 + $0x58] sm:$0xff]  ;;  %v217_v32 = vld [vmem:[%s1177_s14 + $0x20] sm:$0xff]  ;;  %v218_v34 = vld [vmem:[%s1177_s14 + $0x28] sm:$0xff] }
  0x82   : > { %634 = vmatprep.subr.bf16.mxu0 %v633_v8  ;;  %659 = vmatprep.subr.bf16.mxu1 %v633_v8  ;;  %v225_v33 = vld [vmem:[%s1177_s14 + $0x60] sm:$0xff]  ;;  %v226_v35 = vld [vmem:[%s1177_s14 + $0x68] sm:$0xff]  ;;  %v219_v36 = vld [vmem:[%s1177_s14 + $0x30] sm:$0xff]  ;;  %p836_p7 = por %p835_p5, %p834_p8 }
  0x83   : > { %v227_v37 = vld [vmem:[%s1177_s14 + $0x70] sm:$0xff]  ;;  %v220_v38 = vld [vmem:[%s1177_s14 + $0x38] sm:$0xff] }
  0x84   : > { %v228_v39 = vld [vmem:[%s1177_s14 + $0x78] sm:$0xff]  ;;  %p837_p12 = pnand %p836_p7, %p830_p4 }
  0x85   : > { %636 = vmatpush3.bf16.msra.mxu0 %v633_v8  ;;  %667 = vmatpush3.bf16.msra.mxu1 %v633_v8 }
  0x86   : > { %638 = vmatprep.subr.bf16.mxu0 %v637_v13  ;;  %660 = vmatprep.subr.bf16.mxu1 %v637_v13 }
  0x89   : > { %640 = vmatpush3.bf16.msra.mxu0 %v637_v13  ;;  %668 = vmatpush3.bf16.msra.mxu1 %v637_v13 }
  0x8a   : > { %642 = vmatprep.subr.bf16.mxu0 %v641_v16  ;;  %661 = vmatprep.subr.bf16.mxu1 %v641_v16 }
  0x8d   : > { %644 = vmatpush3.bf16.msra.mxu0 %v641_v16  ;;  %669 = vmatpush3.bf16.msra.mxu1 %v641_v16 }
  0x8e   : > { %646 = vmatprep.subr.bf16.mxu0 %v645_v19  ;;  %662 = vmatprep.subr.bf16.mxu1 %v645_v19 }
  0x91   : > { %648 = vmatpush3.bf16.msra.mxu0 %v645_v19  ;;  %670 = vmatpush3.bf16.msra.mxu1 %v645_v19 }
  0x92   : > { %650 = vmatprep.subr.bf16.mxu0 %v649_v22  ;;  %663 = vmatprep.subr.bf16.mxu1 %v649_v22 }
  0x95   : > { %652 = vmatpush3.bf16.msra.mxu0 %v649_v22  ;;  %671 = vmatpush3.bf16.msra.mxu1 %v649_v22 }
  0x96   : > { %654 = vmatprep.subr.bf16.mxu0 %v653_v25  ;;  %664 = vmatprep.subr.bf16.mxu1 %v653_v25 }
  0x99   : > { %656 = vmatpush3.bf16.msra.mxu0 %v653_v25  ;;  %672 = vmatpush3.bf16.msra.mxu1 %v653_v25 }
  0x9c   : > { %602 = vmatmul.mubr.f32.vlgmr.msra.gmra.mrb[0].mxu0 %v214_v26  ;;  %614 = vmatmul.mubr.f32.vlgmr.msra.gmra.mrb[0].mxu1 %v222_v27 }
  0x9d   : > { %604 = vmatprep.mubr.f32.mxu0 %v215_v28  ;;  %616 = vmatprep.mubr.f32.mxu1 %v223_v29 }
  0xa0   : > { %605 = vmatmul.mubr.f32.gmra.mrb[2].mxu0 %v216_v30  ;;  %617 = vmatmul.mubr.f32.gmra.mrb[2].mxu1 %v224_v31 }
  0xa1   : > { %607 = vmatprep.mubr.f32.mxu0 %v217_v32  ;;  %619 = vmatprep.mubr.f32.mxu1 %v225_v33 }
  0xa4   : > { %608 = vmatmul.mubr.f32.gmra.mrb[4].mxu0 %v218_v34  ;;  %620 = vmatmul.mubr.f32.gmra.mrb[4].mxu1 %v226_v35 }
  0xa5   : > { %610 = vmatprep.mubr.f32.mxu0 %v219_v36  ;;  %622 = vmatprep.mubr.f32.mxu1 %v227_v37 }
  0xa8   : > { %611 = vmatmul.mubr.f32.gmra.mrb[6].mxu0 %v220_v38  ;;  %623 = vmatmul.mubr.f32.gmra.mrb[6].mxu1 %v228_v39 }
 0x16f   : > { %v603_v40 = vpop.f32.mrb[0].mxu0  ;;  %v615_v41 = vpop.f32.mrb[0].mxu1 }
 0x170   : > { %391 = vst [vmem:[%s1224_s8 + $0x8] sm:$0xff] %v603_v40  ;;  %399 = vst [vmem:[%s1224_s8 + $0x48] sm:$0xff] %v615_v41  ;;  %v311_v42 = vpop.f32.mrb[1].mxu0  ;;  %v351_v43 = vpop.f32.mrb[1].mxu1 }
 0x171   : > { %390 = vst [vmem:[%s1224_s8] sm:$0xff] %v311_v42  ;;  %398 = vst [vmem:[%s1224_s8 + $0x40] sm:$0xff] %v351_v43 }
 0x173   : > { %v606_v44 = vpop.f32.mrb[2].mxu0  ;;  %v618_v45 = vpop.f32.mrb[2].mxu1 }
 0x174   : > { %393 = vst [vmem:[%s1224_s8 + $0x18] sm:$0xff] %v606_v44  ;;  %401 = vst [vmem:[%s1224_s8 + $0x58] sm:$0xff] %v618_v45  ;;  %v321_v46 = vpop.f32.mrb[3].mxu0  ;;  %v361_v47 = vpop.f32.mrb[3].mxu1 }
 0x175   : > { %392 = vst [vmem:[%s1224_s8 + $0x10] sm:$0xff] %v321_v46  ;;  %400 = vst [vmem:[%s1224_s8 + $0x50] sm:$0xff] %v361_v47 }
 0x177   : > { %v609_v48 = vpop.f32.mrb[4].mxu0  ;;  %v621_v49 = vpop.f32.mrb[4].mxu1 }
 0x178   : > { %395 = vst [vmem:[%s1224_s8 + $0x28] sm:$0xff] %v609_v48  ;;  %403 = vst [vmem:[%s1224_s8 + $0x68] sm:$0xff] %v621_v49  ;;  %v331_v50 = vpop.f32.mrb[5].mxu0  ;;  %v371_v51 = vpop.f32.mrb[5].mxu1 }
 0x179   : > { %394 = vst [vmem:[%s1224_s8 + $0x20] sm:$0xff] %v331_v50  ;;  %402 = vst [vmem:[%s1224_s8 + $0x60] sm:$0xff] %v371_v51 }
 0x17b   : > { %v612_v52 = vpop.f32.mrb[6].mxu0  ;;  %v624_v53 = vpop.f32.mrb[6].mxu1 }
 0x17c   : > { %397 = vst [vmem:[%s1224_s8 + $0x38] sm:$0xff] %v612_v52  ;;  %405 = vst [vmem:[%s1224_s8 + $0x78] sm:$0xff] %v624_v53  ;;  %v341_v54 = vpop.f32.mrb[7].mxu0  ;;  %v381_v55 = vpop.f32.mrb[7].mxu1 }
 0x17d   : > { %396 = vst [vmem:[%s1224_s8 + $0x30] sm:$0xff] %v341_v54  ;;  %404 = vst [vmem:[%s1224_s8 + $0x70] sm:$0xff] %v381_v55 }
 0x17e   : > { %840 = shalt.err (!%p837_p12)
}
 0x17f   : > { %s841_s15 = scalar_lea.hbm %s1243_s7, 2048  ;;  %s845_s5 = scalar_lea.hbm %s1304_s3, 14336 }
 0x180   : > { %p842_p2 = scmp.ne.s32.totalorder %s1243_s7, %s841_s15  ;;  %p846_p6 = scmp.lt.u32.totalorder %s1243_s7, %s1304_s3 }
 0x181   : > { %p847_p9 = scmp.lt.u32.totalorder %s845_s5, %s841_s15  ;;  %p849_p10 = scmp.lt.u32.totalorder %s841_s15, %s1243_s7 }
 0x182   : > { %p843_p3 = pnand %p842_p2, %p1333_p11 }
 0x183   : > { %p848_p13 = por %p847_p9, %p846_p6 }
 0x184   : > { %p844_p1 = pneg %p843_p3 }
 0x185   : > { %p850_p0 = por %p849_p10, %p848_p13 }
 0x187   : > { %p851_p4 = pnand %p850_p0, %p844_p1 }
 0x189   : > { %854 = shalt.err (!%p851_p4)
}
 0x18a   : > { %s931_s8 = smov 128   ;;  %s932_s20 = smov 8  }
 0x18b   : > { %679 = dma.vmem_to_hbm [thread:$0]  (%p1333_p11), %s1245_s16, 2048, %s1243_s7, %s407_s28, %s931_s8, %s931_s8, %s932_s20  }
 0x18c PF: > { %p695_p8 = scmp.ge.s32.totalorder %s923_s27, 2  ;;  %s435_s13 = sand.u32 1, %s911_s25  }
 0x18d   : > { %p1334_p5 = scmp.ne.s32.totalorder %s1317_s11, 0  ;;  %s436_s18 = scalar_lea.sflag [#allocation6], %s435_s13 }
 0x18f   : > { %p691_p7 = pnand %p695_p8, %p1334_p5 }
 0x191   : > { %894 = dma.done.wait (!%p691_p7), %s436_s18, 2048  }
 0x192   : > { %896 = vsyncadd (!%p691_p7), %s436_s18, 4294965248  ;;  %p23_p11 = scmp.ge.s32.totalorder %s1005_s30, 9   ;;  %s1335_s22 = smov %s903_s23 }
 0x193   : > { %s1336_s23 = smov %s907_s24  ;;  %s1337_s24 = smov %s1123_s12 }
 0x194   : > { %s1338_s25 = smov %s915_s26  ;;  %s1339_s26 = smov %s919_s0 }
 0x195   : > { %s1340_s0 = smov %s1017_s6  ;;  %s1341_s27 = smov %s1005_s30 }
 0x196   :  { %25 = sbr.rel (!%p23_p11) target bundleno = 21 (0x15), region = 86 }
 0x19d   :  { %441 = vsyncpa [#allocation5], 1 }
 0x19e   :  { %443 = vsyncpa [#allocation5 + $0x1], 1 }
 0x19f   :  { %444 = vsyncpa [#allocation8], 1 }
 0x1a0   :  { %446 = vsyncpa [#allocation8 + $0x1], 1 }
 0x1a1   :  { %447 = vsyncpa [#allocation6], 1 }
 0x1a2   :  { %449 = vsyncpa [#allocation6 + $0x1], 1 }

</bundles_post_ra>
